<compile_context>
chip_gen: v7x
topology: tpu7x:2x2x1
jax: 0.10.0
libtpu: 0.0.40
codegen_flags: <defaults>
</compile_context>

<pallas_src>
import jax
import jax.numpy as jnp
from jax import lax
from jax.experimental import pallas as pl
from jax.experimental.pallas import tpu as pltpu


_PAD_VALUE = 1e-12
_NEG_SENTINEL = -1e30
_SMALL_WORK_THRESHOLD = 1 << 18   # B * F * n_y below this -> plain XLA path


def _round_up(x: int, m: int) -> int:
    return ((x + m - 1) // m) * m


def _vmem_budget():
    """(vmem_limit_bytes, working_set_target, tile_b_cap) for this TPU generation."""
    cap = 64 * 1024 * 1024                      # conservative default (v7x per-TC VMEM)
    try:
        cap = int(getattr(pltpu.get_tpu_info(), "vmem_capacity_bytes", cap))
    except Exception:
        pass
    if cap >= 128 * 1024 * 1024:                # v5e / v6e: 128 MiB physical VMEM
        return 96 * 1024 * 1024, 64 * 1024 * 1024, 2048
    return 32 * 1024 * 1024, 20 * 1024 * 1024, 512   # v7x: 64 MiB per TC


def _resident_spec(block_shape, index_map):
    """BlockSpec for an operand with a constant index map: single VMEM buffer."""
    try:
        return pl.BlockSpec(block_shape, index_map, pipeline_mode=pl.Buffered(1))
    except Exception:        # older BlockSpec signature: fall back to default buffering
        return pl.BlockSpec(block_shape, index_map)


def _masked_softmax(logits, n_active):
    """Numerically-stable softmax over columns [0, n_active); others -> 1e-12."""
    col = lax.broadcasted_iota(jnp.int32, logits.shape, dimension=1)
    active = col < n_active
    masked = jnp.where(active, logits, jnp.float32(_NEG_SENTINEL))
    m = jnp.max(masked, axis=-1, keepdims=True)
    e = jnp.exp(masked - m)                       # inactive cols underflow to exactly 0
    denom = jnp.maximum(jnp.sum(e, axis=-1, keepdims=True), jnp.float32(1e-30))
    inv = pl.reciprocal(denom, approx=True)       # EUP slot, frees the VALU
    inv = inv * (2.0 - denom * inv)               # one Newton step -> ~f32 accuracy
    return jnp.where(active, e * inv, jnp.float32(_PAD_VALUE))


def _cluster_encoder_kernel(n_active_ref, h_ref, w_ref, b_ref, out_ref):
    """Resident-weight path: one MXU matmul + masked softmax per batch tile."""
    logits = jnp.dot(h_ref[...], w_ref[...],
                     preferred_element_type=jnp.float32) + b_ref[...]
    out_ref[...] = _masked_softmax(logits, n_active_ref[0]).astype(out_ref.dtype)


def _cluster_encoder_kernel_ktiled(n_active_ref, h_ref, w_ref, b_ref, out_ref, acc_ref):
    """K-tiled path: accumulate partial matmuls over feature tiles, finalize at k==last."""
    k = pl.program_id(1)

    @pl.when(k == 0)
    def _():
        acc_ref[...] = jnp.zeros_like(acc_ref)

    acc_ref[...] += jnp.dot(h_ref[...], w_ref[...],
                            preferred_element_type=jnp.float32)

    @pl.when(k == pl.num_programs(1) - 1)
    def _():
        logits = acc_ref[...] + b_ref[...]
        out_ref[...] = _masked_softmax(logits, n_active_ref[0]).astype(out_ref.dtype)


def _cluster_encoder_jax(hiddens, weight, bias, n_active, n_y):
    """Fused pure-JAX fallback for tiny problems (mask-based, traced n_active ok)."""
    logits = (hiddens.astype(jnp.float32) @ weight.astype(jnp.float32)
              + bias.astype(jnp.float32))
    col = jnp.arange(n_y, dtype=jnp.int32)[None, :]
    active = col < n_active
    masked = jnp.where(active, logits, jnp.float32(_NEG_SENTINEL))
    m = jnp.max(masked, axis=-1, keepdims=True)
    e = jnp.where(active, jnp.exp(masked - m), 0.0)
    denom = jnp.maximum(jnp.sum(e, axis=-1, keepdims=True), 1e-30)
    return jnp.where(active, e / denom, jnp.float32(_PAD_VALUE))


def cluster_encoder(hiddens, weight, bias, n_y_active, n_y, *,
                    compute_dtype=jnp.float32,     # pass bf16 inputs + bf16 here for the
                                                   # memory-bound large-F regime
                    tile_b=None, tile_k=None,
                    force_pallas=False, force_ktile=False, slice_output=True):
    """ClusterEncoder forward.

    hiddens: [B, F]; weight: [F, n_y] (transpose of nn.Linear's [n_y, F]);
    bias: [n_y]; n_y_active: int (python or traced); n_y: python int.
    slice_output=False returns the padded (B_pad, n_pad) buffer (skips a copy).
    """
    assert hiddens.ndim == 2
    B, F = hiddens.shape

    if n_y <= 1:
        # PyTorch else-branch: cluster_score = ones_like(logits).
        return jnp.ones((B, n_y), dtype=jnp.promote_types(hiddens.dtype, weight.dtype))

    # Clamp so zero-padded weight columns can never be treated as active.
    n_active = jnp.clip(jnp.asarray(n_y_active, dtype=jnp.int32), 0, n_y)

    # Tiny problems: pallas_call fixed overhead dwarfs the work -> fused XLA path.
    if not force_pallas and (B * F * n_y) < _SMALL_WORK_THRESHOLD:
        return _cluster_encoder_jax(hiddens, weight, bias, n_active, n_y)

    # ---- generation-gated VMEM budget & lane/sublane-aligned padded shapes -
    vmem_limit, ws_target, tile_b_cap = _vmem_budget()
    n_pad = _round_up(n_y, 128)
    in_bytes = jnp.dtype(compute_dtype).itemsize
    B8 = _round_up(B, 8)

    # K-tile the feature axis when the resident weight would eat the VMEM budget.
    use_ktile = force_ktile or (F * n_pad * in_bytes > ws_target // 2)

    if use_ktile:
        if tile_k is None:
            tile_k = min(512, _round_up(F, 128))
        tile_k = max(128, _round_up(int(tile_k), 128))
        F_pad = _round_up(F, tile_k)

        def working_set_bytes(tb):
            return (2 * tb * tile_k * in_bytes       # hiddens tiles (double-buffered)
                    + 2 * tile_k * n_pad * in_bytes  # weight k-tiles (double-buffered)
                    + 2 * tb * n_pad * 4             # output tiles (double-buffered, f32)
                    + tb * n_pad * 4                 # accumulator scratch
                    + n_pad * 4)                     # bias (single buffer)
    else:
        F_pad = F

        def working_set_bytes(tb):
            return (2 * tb * F * in_bytes            # hiddens tiles (double-buffered)
                    + F * n_pad * in_bytes           # resident weight (single buffer)
                    + 2 * tb * n_pad * 4             # output tiles (double-buffered, f32)
                    + n_pad * 4)                     # bias (single buffer)

    auto_tile = tile_b is None
    if auto_tile:
        tile_b = tile_b_cap
        while tile_b > 8 and working_set_bytes(tile_b) > ws_target:
            tile_b //= 2
    tile_b = max(8, min(_round_up(int(tile_b), 8), B8))
    if auto_tile:
        # Keep >= 2 row-parallel grid steps so v7x's second TensorCore gets work.
        if B8 >= 16:
            tile_b = min(tile_b, _round_up((B8 + 1) // 2, 8))
        # Shrink tile_b while the trailing tile would be mostly padding (>12.5% waste).
        while tile_b > 8 and (_round_up(B8, tile_b) - B8) * 8 > B8:
            tile_b = max(8, _round_up(tile_b // 2, 8))
    B_pad = _round_up(B8, tile_b)

    # ---- pad operands -------------------------------------------------------
    h = hiddens.astype(compute_dtype)
    w = weight.astype(compute_dtype)
    b = bias.astype(jnp.float32)
    if B_pad != B or F_pad != F:
        h = jnp.pad(h, ((0, B_pad - B), (0, F_pad - F)))
    if F_pad != F or n_pad != n_y:
        w = jnp.pad(w, ((0, F_pad - F), (0, n_pad - n_y)))
    if n_pad != n_y:
        b = jnp.pad(b, ((0, n_pad - n_y),))
    b2 = b.reshape(1, n_pad)
    n_active_arr = n_active.reshape(1)

    compiler_params = pltpu.CompilerParams(
        dimension_semantics=(("parallel", "arbitrary") if use_ktile else ("parallel",)),
        vmem_limit_bytes=vmem_limit,
    )

    if use_ktile:
        grid = (B_pad // tile_b, F_pad // tile_k)
        grid_spec = pltpu.PrefetchScalarGridSpec(
            num_scalar_prefetch=1,                                           # n_y_active -> SMEM
            grid=grid,
            in_specs=[
                pl.BlockSpec((tile_b, tile_k), lambda i, k, n_ref: (i, k)),  # hiddens tile
                pl.BlockSpec((tile_k, n_pad), lambda i, k, n_ref: (k, 0)),   # weight k-tile
                _resident_spec((1, n_pad), lambda i, k, n_ref: (0, 0)),      # bias (resident)
            ],
            out_specs=pl.BlockSpec((tile_b, n_pad), lambda i, k, n_ref: (i, 0)),
            scratch_shapes=[pltpu.VMEM((tile_b, n_pad), jnp.float32)],       # f32 accumulator
        )
        kernel = _cluster_encoder_kernel_ktiled
    else:
        grid = (B_pad // tile_b,)
        grid_spec = pltpu.PrefetchScalarGridSpec(
            num_scalar_prefetch=1,                                           # n_y_active -> SMEM
            grid=grid,
            in_specs=[
                pl.BlockSpec((tile_b, F), lambda i, n_ref: (i, 0)),          # hiddens tile
                _resident_spec((F, n_pad), lambda i, n_ref: (0, 0)),         # weight (resident)
                _resident_spec((1, n_pad), lambda i, n_ref: (0, 0)),         # bias (resident)
            ],
            out_specs=pl.BlockSpec((tile_b, n_pad), lambda i, n_ref: (i, 0)),
        )
        kernel = _cluster_encoder_kernel

    out_padded = pl.pallas_call(
        kernel,
        out_shape=jax.ShapeDtypeStruct((B_pad, n_pad), jnp.float32),
        grid_spec=grid_spec,
        compiler_params=compiler_params,
    )(n_active_arr, h, w, b2)

    if not slice_output:
        return out_padded        # padded (B_pad, n_pad); caller slices / consumes directly
    return out_padded[:B, :n_y]


def _reference(hiddens, weight, bias, n_y_active, n_y):
    """Pure-JAX reference mirroring the PyTorch forward (static n_y_active slice)."""
    logits = hiddens @ weight + bias
    if n_y <= 1:
        return jnp.ones_like(logits)
    sm = jax.nn.softmax(logits[:, :n_y_active], axis=1)
    return jnp.pad(sm, ((0, 0), (0, n_y - n_y_active)), constant_values=1e-12)


if __name__ == "__main__":
    key = jax.random.PRNGKey(0)

    # ---- test 1: small shapes from the module spec (single tile, resident W) ----
    B, feature_size, n_y, n_y_active = 8, 32, 16, 10
    k_h, k_w, k_b, key = jax.random.split(key, 4)
    hiddens = jax.random.normal(k_h, (B, feature_size), dtype=jnp.float32)
    bound = 1.0 / (feature_size ** 0.5)
    weight = jax.random.uniform(k_w, (feature_size, n_y), jnp.float32, -bound, bound)
    bias = jax.random.uniform(k_b, (n_y,), jnp.float32, -bound, bound)

    out = cluster_encoder(hiddens, weight, bias, n_y_active, n_y, force_pallas=True)
    out = jax.block_until_ready(out)
    ref = _reference(hiddens, weight, bias, n_y_active, n_y)
    assert out.shape == (B, n_y)
    assert jnp.allclose(out, ref, atol=1e-5, rtol=1e-5), "test-1 mismatch vs reference"

    # ---- test 2: multi-tile grid + batch / n_y padding (explicit tile_b) --------
    B2, F2, n_y2, n_act2 = 272, 64, 40, 33
    k_h2, k_w2, k_b2, key = jax.random.split(key, 4)
    hiddens2 = jax.random.normal(k_h2, (B2, F2), dtype=jnp.float32)
    bound2 = 1.0 / (F2 ** 0.5)
    weight2 = jax.random.uniform(k_w2, (F2, n_y2), jnp.float32, -bound2, bound2)
    bias2 = jax.random.uniform(k_b2, (n_y2,), jnp.float32, -bound2, bound2)

    out2 = cluster_encoder(hiddens2, weight2, bias2, n_act2, n_y2,
                           tile_b=128, force_pallas=True)
    out2 = jax.block_until_ready(out2)
    ref2 = _reference(hiddens2, weight2, bias2, n_act2, n_y2)
    assert out2.shape == (B2, n_y2)
    assert jnp.allclose(out2, ref2, atol=1e-5, rtol=1e-5), "test-2 mismatch vs reference"

    # ---- test 3: K-tiled (feature-reduction) path, auto tile_b ------------------
    B3, F3, n_y3, n_act3 = 64, 256, 200, 150
    k_h3, k_w3, k_b3, key = jax.random.split(key, 4)
    hiddens3 = jax.random.normal(k_h3, (B3, F3), dtype=jnp.float32)
    bound3 = 1.0 / (F3 ** 0.5)
    weight3 = jax.random.uniform(k_w3, (F3, n_y3), jnp.float32, -bound3, bound3)
    bias3 = jax.random.uniform(k_b3, (n_y3,), jnp.float32, -bound3, bound3)

    out3 = cluster_encoder(hiddens3, weight3, bias3, n_act3, n_y3,
                           tile_k=128, force_pallas=True, force_ktile=True)
    out3 = jax.block_until_ready(out3)
    ref3 = _reference(hiddens3, weight3, bias3, n_act3, n_y3)
    assert out3.shape == (B3, n_y3)
    assert jnp.allclose(out3, ref3, atol=1e-5, rtol=1e-5), "test-3 mismatch vs reference"

    print("KERNEL_OK")
</pallas_src>

<mosaic_0001>
module attributes {stable_mosaic.version = 11 : i64} {
  func.func @_cluster_encoder_kernel(%arg0: i32, %arg1: memref<1xi32, #tpu.memory_space<smem>>, %arg2: memref<8x32xf32, #tpu.memory_space<vmem>>, %arg3: memref<32x128xf32, #tpu.memory_space<vmem>>, %arg4: memref<1x128xf32, #tpu.memory_space<vmem>>, %arg5: memref<8x128xf32, #tpu.memory_space<vmem>>) attributes {dimension_semantics = [#tpu.dimension_semantics<parallel>], iteration_bounds = array<i64: 1>, scalar_prefetch = 1 : i64, scratch_operands = 0 : i64, tpu.core_type = #tpu.core_type<tc>, window_params = [{transform_indices = @transform_0, window_bounds = array<i64: 8, 32>}, {pipeline_mode = #tpu.pipeline_mode<synchronous>, transform_indices = @transform_1, window_bounds = array<i64: 32, 128>}, {pipeline_mode = #tpu.pipeline_mode<synchronous>, transform_indices = @transform_2, window_bounds = array<i64: 1, 128>}, {transform_indices = @transform_3, window_bounds = array<i64: 8, 128>}]} {
    %c0 = arith.constant 0 : index
    %c0_0 = arith.constant 0 : index
    %0 = vector.load %arg2[%c0, %c0_0] : memref<8x32xf32, #tpu.memory_space<vmem>>, vector<8x32xf32>
    %c0_1 = arith.constant 0 : index
    %c0_2 = arith.constant 0 : index
    %1 = vector.load %arg3[%c0_1, %c0_2] : memref<32x128xf32, #tpu.memory_space<vmem>>, vector<32x128xf32>
    %cst = arith.constant dense<0.000000e+00> : vector<8x128xf32>
    %2 = tpu.matmul %0, %1, %cst {dimension_numbers = #tpu.dot_dimension_numbers<[1], [0], [0], [1], [0, 0, 1, 1], [], []>} : vector<8x32xf32>, vector<32x128xf32>, vector<8x128xf32> -> vector<8x128xf32>
    %c0_3 = arith.constant 0 : index
    %c0_4 = arith.constant 0 : index
    %3 = vector.load %arg4[%c0_3, %c0_4] : memref<1x128xf32, #tpu.memory_space<vmem>>, vector<1x128xf32>
    %4 = vector.broadcast %3 : vector<1x128xf32> to vector<8x128xf32>
    %5 = arith.addf %2, %4 : vector<8x128xf32>
    %c0_5 = arith.constant 0 : index
    %6 = memref.load %arg1[%c0_5] : memref<1xi32, #tpu.memory_space<smem>>
    %7 = tpu.iota {dimensions = array<i32: 1>} : vector<8x128xi32>
    %8 = vector.broadcast %6 : i32 to vector<8x128xi32>
    %9 = arith.cmpi slt, %7, %8 : vector<8x128xi32>
    %cst_6 = arith.constant -1.000000e+30 : f32
    %10 = vector.broadcast %cst_6 : f32 to vector<8x128xf32>
    %11 = arith.select %9, %5, %10 : vector<8x128xi1>, vector<8x128xf32>
    %cst_7 = arith.constant dense<0xFF800000> : vector<8xf32>
    %12 = vector.multi_reduction <maximumf>, %11, %cst_7 [1] : vector<8x128xf32> to vector<8xf32>
    %13 = vector.shape_cast %12 : vector<8xf32> to vector<8x1xf32>
    %14 = vector.broadcast %13 : vector<8x1xf32> to vector<8x128xf32>
    %15 = arith.subf %11, %14 : vector<8x128xf32>
    %16 = math.exp %15 : vector<8x128xf32>
    %cst_8 = arith.constant dense<0.000000e+00> : vector<8xf32>
    %17 = vector.multi_reduction <add>, %16, %cst_8 [1] : vector<8x128xf32> to vector<8xf32>
    %18 = vector.shape_cast %17 : vector<8xf32> to vector<8x1xf32>
    %cst_9 = arith.constant 1.000000e-30 : f32
    %19 = vector.broadcast %cst_9 : f32 to vector<8x1xf32>
    %20 = arith.maximumf %18, %19 : vector<8x1xf32>
    %21 = tpu.reciprocal %20 {approx = true} : vector<8x1xf32> -> vector<8x1xf32>
    %22 = arith.mulf %20, %21 : vector<8x1xf32>
    %cst_10 = arith.constant 2.000000e+00 : f32
    %23 = vector.broadcast %cst_10 : f32 to vector<8x1xf32>
    %24 = arith.subf %23, %22 : vector<8x1xf32>
    %25 = arith.mulf %21, %24 : vector<8x1xf32>
    %26 = vector.broadcast %25 : vector<8x1xf32> to vector<8x128xf32>
    %27 = arith.mulf %16, %26 : vector<8x128xf32>
    %cst_11 = arith.constant 9.99999996E-13 : f32
    %28 = vector.broadcast %cst_11 : f32 to vector<8x128xf32>
    %29 = arith.select %9, %27, %28 : vector<8x128xi1>, vector<8x128xf32>
    %c0_12 = arith.constant 0 : index
    %c0_13 = arith.constant 0 : index
    %30 = vector.load %arg5[%c0_12, %c0_13] : memref<8x128xf32, #tpu.memory_space<vmem>>, vector<8x128xf32>
    tpu.vector_store %arg5[%c0_12, %c0_13], %29 {strides = array<i32>} : memref<8x128xf32, #tpu.memory_space<vmem>>, vector<8x128xf32>,
    return
  }
  func.func @transform_0(%arg0: i32, %arg1: memref<1xi32, #tpu.memory_space<smem>>) -> (i32, i32) {
    %c0_i32 = arith.constant 0 : i32
    %c0_i32_0 = arith.constant 0 : i32
    return %arg0, %c0_i32 : i32, i32
  }
  func.func @transform_1(%arg0: i32, %arg1: memref<1xi32, #tpu.memory_space<smem>>) -> (i32, i32) {
    %c0_i32 = arith.constant 0 : i32
    %c0_i32_0 = arith.constant 0 : i32
    %c0_i32_1 = arith.constant 0 : i32
    return %c0_i32, %c0_i32_0 : i32, i32
  }
  func.func @transform_2(%arg0: i32, %arg1: memref<1xi32, #tpu.memory_space<smem>>) -> (i32, i32) {
    %c0_i32 = arith.constant 0 : i32
    %c0_i32_0 = arith.constant 0 : i32
    %c0_i32_1 = arith.constant 0 : i32
    return %c0_i32, %c0_i32_0 : i32, i32
  }
  func.func @transform_3(%arg0: i32, %arg1: memref<1xi32, #tpu.memory_space<smem>>) -> (i32, i32) {
    %c0_i32 = arith.constant 0 : i32
    %c0_i32_0 = arith.constant 0 : i32
    return %arg0, %c0_i32 : i32, i32
  }
}

</mosaic_0001>

<bundles_post_ra>
// kernel: tpu_custom_call.1
= control target key start
LH: loop header
LB: loop body
LE: loop exit
PB: predicated region body
PF: predicated region fallthrough
CT: control target
= control target key end

     0   :  { %10 = vsyncpa [#allocation5], 0  ;;  %s364_s0 = inlined_call_operand.<no memory space> [shape: s32[1], index: 0, kind: input, shape index: {}]   ;;  %s365_s1 = inlined_call_operand.hbm [shape: f32[8,32], index: 1, kind: input, shape index: {}]   ;;  %s366_s2 = inlined_call_operand.hbm [shape: f32[32,128], index: 2, kind: input, shape index: {}]   ;;  %s367_s3 = inlined_call_operand.vmem [shape: f32[1,128], index: 3, kind: input, shape index: {}]   ;;  %s368_s4 = inlined_call_operand.hbm [shape: f32[8,128], index: 4, kind: output, shape index: {}]  }
   0x1   :  { %11 = vsyncpa [#allocation8], 0 }
   0x2   :  { %12 = vsyncpa [#allocation6], 0  ;;  %s274_s15 = smov [#allocation4]   ;;  %s275_s17 = smov [#allocation7]  }
   0x3   :  { %s19_s16 = sshll.u32 %s274_s15, 4  ;;  %s28_s18 = sshll.u32 %s275_s17, 4  ;;  %s20_s16 = int_to_ptr.vmem [resolvable:$true] %s19_s16  ;;  %s307_s18 = int_to_ptr.vmem [resolvable:$true] %s28_s18 }
   0x4   :  { %s202_s21 = scalar_lea.hbm %s365_s1, 128 }
   0x5   :  { %p203_p0 = scmp.ne.s32.totalorder %s365_s1, %s202_s21  ;;  %p206_p1 = scmp.lt.u32.totalorder %s202_s21, %s365_s1 }
   0x7   :  { %p208_p2 = pnand %p206_p1, %p203_p0 }
   0x9   :  { %211 = shalt.err (!%p208_p2)
}
   0xa   :  { %s212_s26 = scalar_lea.vmem %s20_s16, 128  ;;  %p217_p4 = scmp.lt.s32.totalorder %s20_s16, %s20_s16 }
   0xb   :  { %p213_p3 = scmp.ne.s32.totalorder %s20_s16, %s212_s26  ;;  %p218_p5 = scmp.lt.s32.totalorder %s212_s26, %s212_s26 }
   0xd   :  { %p219_p6 = por %p218_p5, %p217_p4 }
   0xf   :  { %p220_p7 = pnand %p219_p6, %p213_p3 }
  0x11   :  { %223 = shalt.err (!%p220_p7)
}
  0x12   :  { %22 = dma.hbm_to_vmem [thread:$0]  %s365_s1, 128, %s20_s16, [#allocation5]  }
  0x13   :  { %s224_s5 = scalar_lea.hbm %s366_s2, 512 }
  0x14   :  { %p225_p8 = scmp.ne.s32.totalorder %s366_s2, %s224_s5  ;;  %p228_p9 = scmp.lt.u32.totalorder %s224_s5, %s366_s2 }
  0x16   :  { %p230_p10 = pnand %p228_p9, %p225_p8 }
  0x18   :  { %233 = shalt.err (!%p230_p10)
}
  0x19   :  { %s234_s10 = scalar_lea.vmem %s307_s18, 512  ;;  %p239_p12 = scmp.lt.s32.totalorder %s307_s18, %s307_s18 }
  0x1a   :  { %p235_p11 = scmp.ne.s32.totalorder %s307_s18, %s234_s10  ;;  %p240_p13 = scmp.lt.s32.totalorder %s234_s10, %s234_s10 }
  0x1c   :  { %p241_p0 = por %p240_p13, %p239_p12 }
  0x1e   :  { %p242_p1 = pnand %p241_p0, %p235_p11 }
  0x20   :  { %245 = shalt.err (!%p242_p1)
}
  0x21   :  { %s276_s1 = smov 128   ;;  %s277_s11 = smov 8  }
  0x22   :  { %34 = dma.hbm_to_vmem [thread:$0]  %s366_s2, 512, %s307_s18, [#allocation8], %s276_s1, %s276_s1, %s277_s11  }
  0x23   :  { %268 = dma.done.wait [#allocation5], 128  }
  0x24   :  { %269 = vsyncadd [#allocation5], 4294967168 }
  0x25   :  { %270 = dma.done.wait [#allocation8], 512  }
  0x26   :  { %271 = vsyncadd [#allocation8], 4294966784  ;;  %v278_v0 = vmov 0.0|0.0   ;;  %vm279_vm0 = vmmov 0   ;;  %v280_v1 = vmov 0.0   ;;  %v44_v2 = vld [vmem:[#allocation7] sm:$0xff]  ;;  %v130_v9 = vlaneseq }
  0x27   :  { %184 = vmatprep.subr.bf16.mxu0 %v278_v0  ;;  %181 = vmatprep.mubr.msk.f32.mxu0 %vm279_vm0, %v280_v1  ;;  %v45_v3 = vld [vmem:[#allocation7 + $0x8] sm:$0xff]  ;;  %v46_v4 = vld [vmem:[#allocation7 + $0x10] sm:$0xff]  ;;  %v47_v6 = vld [vmem:[#allocation7 + $0x18] sm:$0xff]  ;;  %vm55_vm1 = vcmask 261120   ;;  %v132_v11 = vstv %s364_s0  ;;  %s281_s0 = smov [#allocation9]  }
  0x28   :  { %v185_v5 = vpack.c.bf16 %v45_v3, %v44_v2  ;;  %v188_v7 = vpack.c.bf16 %v47_v6, %v46_v4  ;;  %v43_v8 = vld [vmem:[#allocation4] sm:$0xff]  ;;  %v131_v10 = vand.u32 127, %v130_v9 }
  0x29   :  { %v166_v12 = vld [vmem:[%s367_s3] ss:$0 sm:$0xff]  ;;  %s156_s3 = sshll.u32 %s281_s0, 4  ;;  %s157_s3 = int_to_ptr.vmem [resolvable:$true] %s156_s3 }
  0x2a   :  { %186 = vmatpush3.bf16.msra.mxu0 %v185_v5  ;;  %vm344_vm2 = vcmp.lt.s32.totalorder %v131_v10, %v132_v11  ;;  %s246_s17 = scalar_lea.vmem %s157_s3, 128  ;;  %p251_p3 = scmp.lt.s32.totalorder %s157_s3, %s157_s3 }
  0x2b   :  { %187 = vmatprep.subr.bf16.mxu0 %v278_v0  ;;  %p247_p2 = scmp.ne.s32.totalorder %s157_s3, %s246_s17  ;;  %p252_p4 = scmp.lt.s32.totalorder %s246_s17, %s246_s17 }
  0x2d   :  { %p253_p5 = por %p252_p4, %p251_p3 }
  0x2e   :  { %189 = vmatpush3.bf16.msra.mxu0 %v188_v7 }
  0x2f   :  { %p254_p6 = pnand %p253_p5, %p247_p2 }
  0x31   :  { %182 = vmatmul.mubr.msk.f32.vlgmr.msra.gmra.mrb[0].mxu0 %vm55_vm1, %v43_v8 }
 0x104   :  { %v125_v13 = vpop.f32.mrb[0].mxu0 }
 0x105   :  { %v126_v15 = vadd.f32 %v166_v12, %v125_v13  ;;  %v183_v16 = vpop.f32.mrb[1].mxu0 }
 0x107   :  { %v134_v17 = vsel %vm344_vm2, %v126_v15, -1e+30 }
 0x108   :  { %135 = vmax.xlane.f32.xlu0 %v134_v17 }
 0x195   :  { %v136_v18 = vpop.xlane.xlu0 %135 }
 0x196   :  { %v137_v19 = vsub.f32 %v134_v17, %v136_v18 }
 0x198   :  { %v138_v20 = vmul.f32 1.442695, %v137_v19 }
 0x19a   :  { %198 = vpow2.f32 %v138_v20 }
 0x1a4   :  { %v199_v21 = vpop.eup %198 }
 0x1a5   :  { %140 = vadd.xlane.f32.xlu0 %v199_v21 }
 0x232   :  { %v141_v22 = vpop.xlane.xlu0 %140 }
 0x233   :  { %v142_v23 = vmax.f32 %v141_v22, 1e-30 }
 0x235   :  { %200 = vrcp.f32 %v142_v23 }
 0x23f   :  { %v201_v24 = vpop.eup %200 }
 0x240   :  { %v144_v25 = vmul.f32 %v201_v24, %v142_v23 }
 0x242   :  { %v145_v26 = vsub.f32 2.0, %v144_v25 }
 0x244   :  { %v146_v27 = vmul.f32 %v201_v24, %v145_v26 }
 0x246   :  { %v147_v28 = vmul.f32 %v199_v21, %v146_v27 }
 0x248   :  { %v148_v29 = vsel %vm344_vm2, %v147_v28, 1e-12 }
 0x249   :  { %149 = vst [vmem:[#allocation9] sm:$0xff] %v148_v29 }
 0x24a   :  { %257 = shalt.err (!%p254_p6)
}
 0x24b   :  { %s258_s20 = scalar_lea.hbm %s368_s4, 128 }
 0x24c   :  { %p259_p7 = scmp.ne.s32.totalorder %s368_s4, %s258_s20  ;;  %p262_p8 = scmp.lt.u32.totalorder %s258_s20, %s368_s4 }
 0x24e   :  { %p264_p9 = pnand %p262_p8, %p259_p7 }
 0x250   :  { %267 = shalt.err (!%p264_p9)
}
 0x251   :  { %159 = dma.vmem_to_hbm [thread:$0]  %s157_s3, 128, %s368_s4, [#allocation6]  }
 0x252   :  { %272 = dma.done.wait [#allocation6], 128  }
 0x253   :  { %273 = vsyncadd [#allocation6], 4294967168 }
 0x254   :  { %163 = vsyncpa [#allocation5], 1 }
 0x255   :  { %164 = vsyncpa [#allocation8], 1 }
 0x256   :  { %165 = vsyncpa [#allocation6], 1 }

</bundles_post_ra>
